<compile_context>
chip_gen: v7x
topology: tpu7x:2x2x1
jax: 0.10.0
libtpu: 0.0.40
codegen_flags: <defaults>
</compile_context>

<pallas_src>
import functools
import math

import jax
import jax.numpy as jnp
from jax.experimental import pallas as pl
from jax.experimental.pallas import tpu as pltpu


def _make_kernel(NB, Cin, Cout, KH, KW, S, HOS):
    """Fused folded-conv kernel.

    x_ref: (NB, Cin, Lp)        zero-padded input, spatial axis flattened with
                                row stride S (already padded by XLA).
    w_ref: (KH*KW, Cout, Cin)   folded weights (pw1 * pw2 * dw).
    b_ref: (Cout, 1)            depthwise bias.
    o_ref: (NB, Cout, HOS)      lane-dense output slab, HOS = HO * S.
    """

    def kernel(x_ref, w_ref, b_ref, o_ref):
        # Hoist the (tiny) weights and the bias broadcast out of all loops.
        w = w_ref[...].astype(jnp.float32)                      # (KH*KW, Cout, Cin)
        bias = jnp.broadcast_to(
            b_ref[...].astype(jnp.float32), (Cout, HOS))        # (Cout, HOS)

        # NB is small and static -> unrolled Python loop; per-image live state is
        # only the (Cout, HOS) accumulator, stored immediately after each image.
        for bi in range(NB):
            x = x_ref[bi].astype(jnp.float32)                   # (Cin, Lp)
            acc = bias
            for kh in range(KH):
                for kw in range(KW):
                    t = kh * KW + kw
                    s = kh * S + kw
                    # Conv tap = contiguous lane slice of the padded, flattened
                    # image; channel mixing + depthwise weight applied on the MXU.
                    acc = acc + jnp.dot(
                        w[t], x[:, s:s + HOS],
                        preferred_element_type=jnp.float32)     # (Cout, HOS)
            o_ref[bi] = acc.astype(o_ref.dtype)                 # lane-dense store

    return kernel


def _images_per_step(n, cap=8):
    """Largest divisor of n that is <= cap (images processed per grid step)."""
    for nb in range(min(n, cap), 0, -1):
        if n % nb == 0:
            return nb
    return 1


@functools.partial(
    jax.jit, static_argnames=("kernel_size", "stride", "padding", "dilation"))
def sbs_conv2d(x, w_pw1, w_pw2, w_dw, b_dw, *, kernel_size,
               stride=(1, 1), padding=(0, 0), dilation=(1, 1)):
    """SubspaceBlueprintSeparableConv2d forward (act=None).

    x     : (N, Cin, H, W)
    w_pw1 : (Mid, Cin, 1, 1)    pointwise conv #1 weight (no bias)
    w_pw2 : (Cout, Mid, 1, 1)   pointwise conv #2 weight (no bias)
    w_dw  : (Cout, 1, KH, KW)   depthwise conv weight
    b_dw  : (Cout,)             depthwise conv bias
    returns (N, Cout, HO, WO), NCHW.
    """
    assert stride == (1, 1) and dilation == (1, 1), \
        "TODO(synk): only stride=1, dilation=1, zeros padding is supported"

    N, Cin, H, W = x.shape
    Mid = w_pw1.shape[0]
    Cout = w_pw2.shape[0]
    KH, KW = kernel_size
    PH, PW = padding
    HO = H + 2 * PH - KH + 1
    WO = W + 2 * PW - KW + 1
    S = W + 2 * PW                     # padded row stride
    HOS = HO * S                       # lane-dense output slab width
    Lp = (H + 2 * PH + 1) * S          # +1 zero row keeps every tap slice in-bounds

    # ---- O(params) weight folding (valid because act1/act2 are Identity) ----
    w_pw = jnp.dot(w_pw2.reshape(Cout, Mid),
                   w_pw1.reshape(Mid, Cin))                       # (Cout, Cin)
    w_fold = (w_dw.reshape(Cout, KH * KW).T[:, :, None]
              * w_pw[None, :, :])                                 # (KH*KW, Cout, Cin)
    bias = b_dw.reshape(Cout, 1)

    # ---- zero padding materialized once by XLA and streamed in with the input ----
    xp = jnp.pad(x, ((0, 0), (0, 0), (PH, PH + 1), (PW, PW)))
    xp = xp.reshape(N, Cin, Lp)

    NB = _images_per_step(N)
    grid = (N // NB,)
    kernel = _make_kernel(NB, Cin, Cout, KH, KW, S, HOS)

    out = pl.pallas_call(
        kernel,
        out_shape=jax.ShapeDtypeStruct((N, Cout, HOS), x.dtype),
        grid_spec=pltpu.PrefetchScalarGridSpec(
            num_scalar_prefetch=0,
            grid=grid,
            in_specs=[
                pl.BlockSpec((NB, Cin, Lp), lambda n: (n, 0, 0)),
                pl.BlockSpec((KH * KW, Cout, Cin), lambda n: (0, 0, 0)),
                pl.BlockSpec((Cout, 1), lambda n: (0, 0)),
            ],
            out_specs=pl.BlockSpec((NB, Cout, HOS), lambda n: (n, 0, 0)),
        ),
        # Batch axis is fully independent -> shard it across v7x's 2 TensorCores.
        compiler_params=pltpu.CompilerParams(dimension_semantics=("parallel",)),
    )(xp, w_fold, bias)

    # Trim the (KW-1) garbage columns per output row; cheap layout plumbing.
    out = out.reshape(N, Cout, HO, S)[:, :, :, :WO]
    return out


def _reference(x, w_pw1, w_pw2, w_dw, b_dw, padding):
    """Pure-JAX reference (XLA convs) for correctness checking."""
    PH, PW = padding
    Cout = w_dw.shape[0]
    dn = ("NCHW", "OIHW", "NCHW")
    y = jax.lax.conv_general_dilated(x, w_pw1, (1, 1), "VALID",
                                     dimension_numbers=dn)
    y = jax.lax.conv_general_dilated(y, w_pw2, (1, 1), "VALID",
                                     dimension_numbers=dn)
    y = jax.lax.conv_general_dilated(y, w_dw, (1, 1), [(PH, PH), (PW, PW)],
                                     feature_group_count=Cout,
                                     dimension_numbers=dn)
    return y + b_dw.reshape(1, -1, 1, 1)


if __name__ == "__main__":
    # Small shapes consistent with the module's __init__ (p=0.25, min_mid=4).
    N, Cin, H, W = 2, 4, 16, 16
    Cout = 8
    KH = KW = 3
    PH = PW = 1
    Mid = min(Cin, max(4, math.ceil(0.25 * Cin)))   # mid_channels = 4

    key = jax.random.PRNGKey(0)
    k1, k2, k3, k4, k5 = jax.random.split(key, 5)
    x = jax.random.normal(k1, (N, Cin, H, W), dtype=jnp.float32)
    w_pw1 = jax.random.normal(k2, (Mid, Cin, 1, 1), dtype=jnp.float32) * 0.3
    w_pw2 = jax.random.normal(k3, (Cout, Mid, 1, 1), dtype=jnp.float32) * 0.3
    w_dw = jax.random.normal(k4, (Cout, 1, KH, KW), dtype=jnp.float32) * 0.3
    b_dw = jax.random.normal(k5, (Cout,), dtype=jnp.float32) * 0.1

    out = sbs_conv2d(x, w_pw1, w_pw2, w_dw, b_dw,
                     kernel_size=(KH, KW), padding=(PH, PW))
    out = jax.block_until_ready(out)

    ref = _reference(x, w_pw1, w_pw2, w_dw, b_dw, (PH, PW))
    assert out.shape == (N, Cout, H, W), out.shape
    err = float(jnp.max(jnp.abs(out - ref)))
    assert jnp.allclose(out, ref, atol=1e-4, rtol=1e-4), err

    print("KERNEL_OK")
</pallas_src>

<mosaic_0001>
module attributes {stable_mosaic.version = 11 : i64} {
  func.func @kernel(%arg0: i32, %arg1: memref<2x4x342xf32, #tpu.memory_space<vmem>>, %arg2: memref<9x8x4xf32, #tpu.memory_space<vmem>>, %arg3: memref<8x1xf32, #tpu.memory_space<vmem>>, %arg4: memref<2x8x288xf32, #tpu.memory_space<vmem>>) attributes {dimension_semantics = [#tpu.dimension_semantics<parallel>], iteration_bounds = array<i64: 1>, scalar_prefetch = 0 : i64, scratch_operands = 0 : i64, tpu.core_type = #tpu.core_type<tc>, window_params = [{transform_indices = @transform_0, window_bounds = array<i64: 2, 4, 342>}, {pipeline_mode = #tpu.pipeline_mode<synchronous>, transform_indices = @transform_1, window_bounds = array<i64: 9, 8, 4>}, {pipeline_mode = #tpu.pipeline_mode<synchronous>, transform_indices = @transform_2, window_bounds = array<i64: 8, 1>}, {transform_indices = @transform_3, window_bounds = array<i64: 2, 8, 288>}]} {
    %c0 = arith.constant 0 : index
    %c0_0 = arith.constant 0 : index
    %c0_1 = arith.constant 0 : index
    %0 = vector.load %arg2[%c0, %c0_0, %c0_1] : memref<9x8x4xf32, #tpu.memory_space<vmem>>, vector<9x8x4xf32>
    %c0_2 = arith.constant 0 : index
    %c0_3 = arith.constant 0 : index
    %1 = vector.load %arg3[%c0_2, %c0_3] : memref<8x1xf32, #tpu.memory_space<vmem>>, vector<8x1xf32>
    %2 = vector.shape_cast %1 : vector<8x1xf32> to vector<8x1xf32>
    %3 = vector.broadcast %2 : vector<8x1xf32> to vector<8x288xf32>
    %c0_4 = arith.constant 0 : index
    %c0_5 = arith.constant 0 : index
    %c0_6 = arith.constant 0 : index
    %4 = vector.load %arg1[%c0_4, %c0_5, %c0_6] : memref<2x4x342xf32, #tpu.memory_space<vmem>>, vector<1x4x342xf32>
    %5 = vector.shape_cast %4 : vector<1x4x342xf32> to vector<4x342xf32>
    %6 = vector.extract_strided_slice %0 {offsets = [0, 0, 0], sizes = [1, 8, 4], strides = [1, 1, 1]} : vector<9x8x4xf32> to vector<1x8x4xf32>
    %7 = vector.shape_cast %6 : vector<1x8x4xf32> to vector<8x4xf32>
    %8 = vector.extract_strided_slice %5 {offsets = [0, 0], sizes = [4, 288], strides = [1, 1]} : vector<4x342xf32> to vector<4x288xf32>
    %cst = arith.constant dense<0.000000e+00> : vector<8x288xf32>
    %9 = tpu.matmul %7, %8, %cst {dimension_numbers = #tpu.dot_dimension_numbers<[1], [0], [0], [1], [0, 0, 1, 1], [], []>} : vector<8x4xf32>, vector<4x288xf32>, vector<8x288xf32> -> vector<8x288xf32>
    %10 = arith.addf %3, %9 : vector<8x288xf32>
    %11 = vector.extract_strided_slice %0 {offsets = [1, 0, 0], sizes = [1, 8, 4], strides = [1, 1, 1]} : vector<9x8x4xf32> to vector<1x8x4xf32>
    %12 = vector.shape_cast %11 : vector<1x8x4xf32> to vector<8x4xf32>
    %13 = vector.extract_strided_slice %5 {offsets = [0, 1], sizes = [4, 288], strides = [1, 1]} : vector<4x342xf32> to vector<4x288xf32>
    %cst_7 = arith.constant dense<0.000000e+00> : vector<8x288xf32>
    %14 = tpu.matmul %12, %13, %cst_7 {dimension_numbers = #tpu.dot_dimension_numbers<[1], [0], [0], [1], [0, 0, 1, 1], [], []>} : vector<8x4xf32>, vector<4x288xf32>, vector<8x288xf32> -> vector<8x288xf32>
    %15 = arith.addf %10, %14 : vector<8x288xf32>
    %16 = vector.extract_strided_slice %0 {offsets = [2, 0, 0], sizes = [1, 8, 4], strides = [1, 1, 1]} : vector<9x8x4xf32> to vector<1x8x4xf32>
    %17 = vector.shape_cast %16 : vector<1x8x4xf32> to vector<8x4xf32>
    %18 = vector.extract_strided_slice %5 {offsets = [0, 2], sizes = [4, 288], strides = [1, 1]} : vector<4x342xf32> to vector<4x288xf32>
    %cst_8 = arith.constant dense<0.000000e+00> : vector<8x288xf32>
    %19 = tpu.matmul %17, %18, %cst_8 {dimension_numbers = #tpu.dot_dimension_numbers<[1], [0], [0], [1], [0, 0, 1, 1], [], []>} : vector<8x4xf32>, vector<4x288xf32>, vector<8x288xf32> -> vector<8x288xf32>
    %20 = arith.addf %15, %19 : vector<8x288xf32>
    %21 = vector.extract_strided_slice %0 {offsets = [3, 0, 0], sizes = [1, 8, 4], strides = [1, 1, 1]} : vector<9x8x4xf32> to vector<1x8x4xf32>
    %22 = vector.shape_cast %21 : vector<1x8x4xf32> to vector<8x4xf32>
    %23 = vector.extract_strided_slice %5 {offsets = [0, 18], sizes = [4, 288], strides = [1, 1]} : vector<4x342xf32> to vector<4x288xf32>
    %cst_9 = arith.constant dense<0.000000e+00> : vector<8x288xf32>
    %24 = tpu.matmul %22, %23, %cst_9 {dimension_numbers = #tpu.dot_dimension_numbers<[1], [0], [0], [1], [0, 0, 1, 1], [], []>} : vector<8x4xf32>, vector<4x288xf32>, vector<8x288xf32> -> vector<8x288xf32>
    %25 = arith.addf %20, %24 : vector<8x288xf32>
    %26 = vector.extract_strided_slice %0 {offsets = [4, 0, 0], sizes = [1, 8, 4], strides = [1, 1, 1]} : vector<9x8x4xf32> to vector<1x8x4xf32>
    %27 = vector.shape_cast %26 : vector<1x8x4xf32> to vector<8x4xf32>
    %28 = vector.extract_strided_slice %5 {offsets = [0, 19], sizes = [4, 288], strides = [1, 1]} : vector<4x342xf32> to vector<4x288xf32>
    %cst_10 = arith.constant dense<0.000000e+00> : vector<8x288xf32>
    %29 = tpu.matmul %27, %28, %cst_10 {dimension_numbers = #tpu.dot_dimension_numbers<[1], [0], [0], [1], [0, 0, 1, 1], [], []>} : vector<8x4xf32>, vector<4x288xf32>, vector<8x288xf32> -> vector<8x288xf32>
    %30 = arith.addf %25, %29 : vector<8x288xf32>
    %31 = vector.extract_strided_slice %0 {offsets = [5, 0, 0], sizes = [1, 8, 4], strides = [1, 1, 1]} : vector<9x8x4xf32> to vector<1x8x4xf32>
    %32 = vector.shape_cast %31 : vector<1x8x4xf32> to vector<8x4xf32>
    %33 = vector.extract_strided_slice %5 {offsets = [0, 20], sizes = [4, 288], strides = [1, 1]} : vector<4x342xf32> to vector<4x288xf32>
    %cst_11 = arith.constant dense<0.000000e+00> : vector<8x288xf32>
    %34 = tpu.matmul %32, %33, %cst_11 {dimension_numbers = #tpu.dot_dimension_numbers<[1], [0], [0], [1], [0, 0, 1, 1], [], []>} : vector<8x4xf32>, vector<4x288xf32>, vector<8x288xf32> -> vector<8x288xf32>
    %35 = arith.addf %30, %34 : vector<8x288xf32>
    %36 = vector.extract_strided_slice %0 {offsets = [6, 0, 0], sizes = [1, 8, 4], strides = [1, 1, 1]} : vector<9x8x4xf32> to vector<1x8x4xf32>
    %37 = vector.shape_cast %36 : vector<1x8x4xf32> to vector<8x4xf32>
    %38 = vector.extract_strided_slice %5 {offsets = [0, 36], sizes = [4, 288], strides = [1, 1]} : vector<4x342xf32> to vector<4x288xf32>
    %cst_12 = arith.constant dense<0.000000e+00> : vector<8x288xf32>
    %39 = tpu.matmul %37, %38, %cst_12 {dimension_numbers = #tpu.dot_dimension_numbers<[1], [0], [0], [1], [0, 0, 1, 1], [], []>} : vector<8x4xf32>, vector<4x288xf32>, vector<8x288xf32> -> vector<8x288xf32>
    %40 = arith.addf %35, %39 : vector<8x288xf32>
    %41 = vector.extract_strided_slice %0 {offsets = [7, 0, 0], sizes = [1, 8, 4], strides = [1, 1, 1]} : vector<9x8x4xf32> to vector<1x8x4xf32>
    %42 = vector.shape_cast %41 : vector<1x8x4xf32> to vector<8x4xf32>
    %43 = vector.extract_strided_slice %5 {offsets = [0, 37], sizes = [4, 288], strides = [1, 1]} : vector<4x342xf32> to vector<4x288xf32>
    %cst_13 = arith.constant dense<0.000000e+00> : vector<8x288xf32>
    %44 = tpu.matmul %42, %43, %cst_13 {dimension_numbers = #tpu.dot_dimension_numbers<[1], [0], [0], [1], [0, 0, 1, 1], [], []>} : vector<8x4xf32>, vector<4x288xf32>, vector<8x288xf32> -> vector<8x288xf32>
    %45 = arith.addf %40, %44 : vector<8x288xf32>
    %46 = vector.extract_strided_slice %0 {offsets = [8, 0, 0], sizes = [1, 8, 4], strides = [1, 1, 1]} : vector<9x8x4xf32> to vector<1x8x4xf32>
    %47 = vector.shape_cast %46 : vector<1x8x4xf32> to vector<8x4xf32>
    %48 = vector.extract_strided_slice %5 {offsets = [0, 38], sizes = [4, 288], strides = [1, 1]} : vector<4x342xf32> to vector<4x288xf32>
    %cst_14 = arith.constant dense<0.000000e+00> : vector<8x288xf32>
    %49 = tpu.matmul %47, %48, %cst_14 {dimension_numbers = #tpu.dot_dimension_numbers<[1], [0], [0], [1], [0, 0, 1, 1], [], []>} : vector<8x4xf32>, vector<4x288xf32>, vector<8x288xf32> -> vector<8x288xf32>
    %50 = arith.addf %45, %49 : vector<8x288xf32>
    %c0_15 = arith.constant 0 : index
    %c0_16 = arith.constant 0 : index
    %c0_17 = arith.constant 0 : index
    %51 = vector.load %arg4[%c0_15, %c0_16, %c0_17] : memref<2x8x288xf32, #tpu.memory_space<vmem>>, vector<1x8x288xf32>
    %52 = vector.shape_cast %51 : vector<1x8x288xf32> to vector<8x288xf32>
    %53 = vector.shape_cast %50 : vector<8x288xf32> to vector<1x8x288xf32>
    tpu.vector_store %arg4[%c0_15, %c0_16, %c0_17], %53 {strides = array<i32>} : memref<2x8x288xf32, #tpu.memory_space<vmem>>, vector<1x8x288xf32>,
    %c1 = arith.constant 1 : index
    %c0_18 = arith.constant 0 : index
    %c0_19 = arith.constant 0 : index
    %54 = vector.load %arg1[%c1, %c0_18, %c0_19] : memref<2x4x342xf32, #tpu.memory_space<vmem>>, vector<1x4x342xf32>
    %55 = vector.shape_cast %54 : vector<1x4x342xf32> to vector<4x342xf32>
    %56 = vector.extract_strided_slice %0 {offsets = [0, 0, 0], sizes = [1, 8, 4], strides = [1, 1, 1]} : vector<9x8x4xf32> to vector<1x8x4xf32>
    %57 = vector.shape_cast %56 : vector<1x8x4xf32> to vector<8x4xf32>
    %58 = vector.extract_strided_slice %55 {offsets = [0, 0], sizes = [4, 288], strides = [1, 1]} : vector<4x342xf32> to vector<4x288xf32>
    %cst_20 = arith.constant dense<0.000000e+00> : vector<8x288xf32>
    %59 = tpu.matmul %57, %58, %cst_20 {dimension_numbers = #tpu.dot_dimension_numbers<[1], [0], [0], [1], [0, 0, 1, 1], [], []>} : vector<8x4xf32>, vector<4x288xf32>, vector<8x288xf32> -> vector<8x288xf32>
    %60 = arith.addf %3, %59 : vector<8x288xf32>
    %61 = vector.extract_strided_slice %0 {offsets = [1, 0, 0], sizes = [1, 8, 4], strides = [1, 1, 1]} : vector<9x8x4xf32> to vector<1x8x4xf32>
    %62 = vector.shape_cast %61 : vector<1x8x4xf32> to vector<8x4xf32>
    %63 = vector.extract_strided_slice %55 {offsets = [0, 1], sizes = [4, 288], strides = [1, 1]} : vector<4x342xf32> to vector<4x288xf32>
    %cst_21 = arith.constant dense<0.000000e+00> : vector<8x288xf32>
    %64 = tpu.matmul %62, %63, %cst_21 {dimension_numbers = #tpu.dot_dimension_numbers<[1], [0], [0], [1], [0, 0, 1, 1], [], []>} : vector<8x4xf32>, vector<4x288xf32>, vector<8x288xf32> -> vector<8x288xf32>
    %65 = arith.addf %60, %64 : vector<8x288xf32>
    %66 = vector.extract_strided_slice %0 {offsets = [2, 0, 0], sizes = [1, 8, 4], strides = [1, 1, 1]} : vector<9x8x4xf32> to vector<1x8x4xf32>
    %67 = vector.shape_cast %66 : vector<1x8x4xf32> to vector<8x4xf32>
    %68 = vector.extract_strided_slice %55 {offsets = [0, 2], sizes = [4, 288], strides = [1, 1]} : vector<4x342xf32> to vector<4x288xf32>
    %cst_22 = arith.constant dense<0.000000e+00> : vector<8x288xf32>
    %69 = tpu.matmul %67, %68, %cst_22 {dimension_numbers = #tpu.dot_dimension_numbers<[1], [0], [0], [1], [0, 0, 1, 1], [], []>} : vector<8x4xf32>, vector<4x288xf32>, vector<8x288xf32> -> vector<8x288xf32>
    %70 = arith.addf %65, %69 : vector<8x288xf32>
    %71 = vector.extract_strided_slice %0 {offsets = [3, 0, 0], sizes = [1, 8, 4], strides = [1, 1, 1]} : vector<9x8x4xf32> to vector<1x8x4xf32>
    %72 = vector.shape_cast %71 : vector<1x8x4xf32> to vector<8x4xf32>
    %73 = vector.extract_strided_slice %55 {offsets = [0, 18], sizes = [4, 288], strides = [1, 1]} : vector<4x342xf32> to vector<4x288xf32>
    %cst_23 = arith.constant dense<0.000000e+00> : vector<8x288xf32>
    %74 = tpu.matmul %72, %73, %cst_23 {dimension_numbers = #tpu.dot_dimension_numbers<[1], [0], [0], [1], [0, 0, 1, 1], [], []>} : vector<8x4xf32>, vector<4x288xf32>, vector<8x288xf32> -> vector<8x288xf32>
    %75 = arith.addf %70, %74 : vector<8x288xf32>
    %76 = vector.extract_strided_slice %0 {offsets = [4, 0, 0], sizes = [1, 8, 4], strides = [1, 1, 1]} : vector<9x8x4xf32> to vector<1x8x4xf32>
    %77 = vector.shape_cast %76 : vector<1x8x4xf32> to vector<8x4xf32>
    %78 = vector.extract_strided_slice %55 {offsets = [0, 19], sizes = [4, 288], strides = [1, 1]} : vector<4x342xf32> to vector<4x288xf32>
    %cst_24 = arith.constant dense<0.000000e+00> : vector<8x288xf32>
    %79 = tpu.matmul %77, %78, %cst_24 {dimension_numbers = #tpu.dot_dimension_numbers<[1], [0], [0], [1], [0, 0, 1, 1], [], []>} : vector<8x4xf32>, vector<4x288xf32>, vector<8x288xf32> -> vector<8x288xf32>
    %80 = arith.addf %75, %79 : vector<8x288xf32>
    %81 = vector.extract_strided_slice %0 {offsets = [5, 0, 0], sizes = [1, 8, 4], strides = [1, 1, 1]} : vector<9x8x4xf32> to vector<1x8x4xf32>
    %82 = vector.shape_cast %81 : vector<1x8x4xf32> to vector<8x4xf32>
    %83 = vector.extract_strided_slice %55 {offsets = [0, 20], sizes = [4, 288], strides = [1, 1]} : vector<4x342xf32> to vector<4x288xf32>
    %cst_25 = arith.constant dense<0.000000e+00> : vector<8x288xf32>
    %84 = tpu.matmul %82, %83, %cst_25 {dimension_numbers = #tpu.dot_dimension_numbers<[1], [0], [0], [1], [0, 0, 1, 1], [], []>} : vector<8x4xf32>, vector<4x288xf32>, vector<8x288xf32> -> vector<8x288xf32>
    %85 = arith.addf %80, %84 : vector<8x288xf32>
    %86 = vector.extract_strided_slice %0 {offsets = [6, 0, 0], sizes = [1, 8, 4], strides = [1, 1, 1]} : vector<9x8x4xf32> to vector<1x8x4xf32>
    %87 = vector.shape_cast %86 : vector<1x8x4xf32> to vector<8x4xf32>
    %88 = vector.extract_strided_slice %55 {offsets = [0, 36], sizes = [4, 288], strides = [1, 1]} : vector<4x342xf32> to vector<4x288xf32>
    %cst_26 = arith.constant dense<0.000000e+00> : vector<8x288xf32>
    %89 = tpu.matmul %87, %88, %cst_26 {dimension_numbers = #tpu.dot_dimension_numbers<[1], [0], [0], [1], [0, 0, 1, 1], [], []>} : vector<8x4xf32>, vector<4x288xf32>, vector<8x288xf32> -> vector<8x288xf32>
    %90 = arith.addf %85, %89 : vector<8x288xf32>
    %91 = vector.extract_strided_slice %0 {offsets = [7, 0, 0], sizes = [1, 8, 4], strides = [1, 1, 1]} : vector<9x8x4xf32> to vector<1x8x4xf32>
    %92 = vector.shape_cast %91 : vector<1x8x4xf32> to vector<8x4xf32>
    %93 = vector.extract_strided_slice %55 {offsets = [0, 37], sizes = [4, 288], strides = [1, 1]} : vector<4x342xf32> to vector<4x288xf32>
    %cst_27 = arith.constant dense<0.000000e+00> : vector<8x288xf32>
    %94 = tpu.matmul %92, %93, %cst_27 {dimension_numbers = #tpu.dot_dimension_numbers<[1], [0], [0], [1], [0, 0, 1, 1], [], []>} : vector<8x4xf32>, vector<4x288xf32>, vector<8x288xf32> -> vector<8x288xf32>
    %95 = arith.addf %90, %94 : vector<8x288xf32>
    %96 = vector.extract_strided_slice %0 {offsets = [8, 0, 0], sizes = [1, 8, 4], strides = [1, 1, 1]} : vector<9x8x4xf32> to vector<1x8x4xf32>
    %97 = vector.shape_cast %96 : vector<1x8x4xf32> to vector<8x4xf32>
    %98 = vector.extract_strided_slice %55 {offsets = [0, 38], sizes = [4, 288], strides = [1, 1]} : vector<4x342xf32> to vector<4x288xf32>
    %cst_28 = arith.constant dense<0.000000e+00> : vector<8x288xf32>
    %99 = tpu.matmul %97, %98, %cst_28 {dimension_numbers = #tpu.dot_dimension_numbers<[1], [0], [0], [1], [0, 0, 1, 1], [], []>} : vector<8x4xf32>, vector<4x288xf32>, vector<8x288xf32> -> vector<8x288xf32>
    %100 = arith.addf %95, %99 : vector<8x288xf32>
    %c1_29 = arith.constant 1 : index
    %c0_30 = arith.constant 0 : index
    %c0_31 = arith.constant 0 : index
    %101 = vector.load %arg4[%c1_29, %c0_30, %c0_31] : memref<2x8x288xf32, #tpu.memory_space<vmem>>, vector<1x8x288xf32>
    %102 = vector.shape_cast %101 : vector<1x8x288xf32> to vector<8x288xf32>
    %103 = vector.shape_cast %100 : vector<8x288xf32> to vector<1x8x288xf32>
    tpu.vector_store %arg4[%c1_29, %c0_30, %c0_31], %103 {strides = array<i32>} : memref<2x8x288xf32, #tpu.memory_space<vmem>>, vector<1x8x288xf32>,
    return
  }
  func.func @transform_0(%arg0: i32) -> (i32, i32, i32) {
    %c0_i32 = arith.constant 0 : i32
    %c0_i32_0 = arith.constant 0 : i32
    %c0_i32_1 = arith.constant 0 : i32
    return %arg0, %c0_i32, %c0_i32_0 : i32, i32, i32
  }
  func.func @transform_1(%arg0: i32) -> (i32, i32, i32) {
    %c0_i32 = arith.constant 0 : i32
    %c0_i32_0 = arith.constant 0 : i32
    %c0_i32_1 = arith.constant 0 : i32
    %c0_i32_2 = arith.constant 0 : i32
    return %c0_i32, %c0_i32_0, %c0_i32_1 : i32, i32, i32
  }
  func.func @transform_2(%arg0: i32) -> (i32, i32) {
    %c0_i32 = arith.constant 0 : i32
    %c0_i32_0 = arith.constant 0 : i32
    %c0_i32_1 = arith.constant 0 : i32
    return %c0_i32, %c0_i32_0 : i32, i32
  }
  func.func @transform_3(%arg0: i32) -> (i32, i32, i32) {
    %c0_i32 = arith.constant 0 : i32
    %c0_i32_0 = arith.constant 0 : i32
    %c0_i32_1 = arith.constant 0 : i32
    return %arg0, %c0_i32, %c0_i32_0 : i32, i32, i32
  }
}

</mosaic_0001>

<bundles_post_ra>
// kernel: sbs_conv2d.1
= control target key start
LH: loop header
LB: loop body
LE: loop exit
PB: predicated region body
PF: predicated region fallthrough
CT: control target
= control target key end

     0   :  { %vm38_vm0 = vcmask 1043456   ;;  %vm34_vm1 = vcmask 31744   ;;  %v3222_v2 = vmov 0.0   ;;  %vm3223_vm2 = vmmov 0   ;;  %s3224_s16 = smov 127   ;;  %s3225_s19 = smov 126   ;;  %s3644_s0 = inlined_call_operand.vmem [shape: f32[2,4,342], index: 0, kind: input, shape index: {}]   ;;  %s3645_s1 = inlined_call_operand.vmem [shape: f32[9,8,4], index: 1, kind: input, shape index: {}]   ;;  %s3646_s2 = inlined_call_operand.vmem [shape: f32[8,1], index: 2, kind: input, shape index: {}]   ;;  %s3647_s3 = inlined_call_operand.vmem [shape: f32[2,8,288], index: 3, kind: output, shape index: {}]  }
   0x1   :  { %v29_v0 = vld [vmem:[%s3644_s0] sm:$0xff]  ;;  %v30_v1 = vld [vmem:[%s3644_s0 + $0x8] sm:$0xf]  ;;  %3048 = vmatprep.subr.mxu1 %v3222_v2  ;;  %3050 = vmatprep.mubr.msk.f32.mxu1 %vm3223_vm2, %v3222_v2  ;;  %s3226_s20 = smov 110   ;;  %s3227_s21 = smov 109   ;;  %v3304_v5 = vld [vmem:[%s3644_s0 + $0xc] sm:$0xff] }
   0x2   :  { %189 = vrot.lane.b32.xlu1 %v29_v0, %s3224_s16  ;;  %v33_v3 = vcombine.high %v29_v0, %v29_v0  ;;  %3049 = vmatpush3.msk.msra.mxu1 %vm38_vm0, %v30_v1  ;;  %v3267_v4 = vld [vmem:[%s3645_s1] sm:$0xff]  ;;  %s3228_s22 = smov 108   ;;  %s3229_s23 = smov 92   ;;  %v3310_v6 = vld [vmem:[%s3644_s0 + $0x14] sm:$0xf]  ;;  %v3315_v7 = vcombine.high %v3304_v5, %v3304_v5  ;;  %vm195_vm3 = vcmask 1039360  }
   0x3   :  { %3051 = vmatmul.mubr.msk.f32.vlgmr.msra.gmra.mrb[0].mxu1 %vm34_vm1, %v3267_v4  ;;  %109 = vmatprep.mubr.f32.mxu0 %v3222_v2  ;;  %s3230_s24 = smov 91   ;;  %s3231_s25 = smov 90   ;;  %v3368_v11 = vld [vmem:[%s3645_s1 + $0x8] sm:$0xff]  ;;  %vm357_vm4 = vcmask 1031168   ;;  %v3232_v14 = vmov 0   ;;  %v23_v19 = vld [vmem:[%s3646_s2] sm:$0xff] }
   0x4   :  { %191 = vrot.lane.b32.xlu0 %v33_v3, %s3224_s16  ;;  %2917 = vmatprep.subr.msk.mxu0 %vm38_vm0, %v33_v3  ;;  %vm519_vm5 = vcmask 900096   ;;  %v3395_v22 = vld [vmem:[%s3645_s1 + $0x10] sm:$0xff]  ;;  %vm681_vm6 = vcmask 891904   ;;  %v3413_v29 = vld [vmem:[%s3645_s1 + $0x18] sm:$0xff]  ;;  %vm843_vm7 = vcmask 883712   ;;  %v3433_v37 = vld [vmem:[%s3645_s1 + $0x20] sm:$0xff] }
   0x5   :  { %2918 = vmatpush1.msk.msra.mxu0 %vm38_vm0, %v29_v0  ;;  %3053 = vmatprep.subr.mxu1 %v3222_v2  ;;  %vm1005_vm8 = vcmask 752640   ;;  %v3451_v43 = vld [vmem:[%s3645_s1 + $0x28] sm:$0xff]  ;;  %vm1167_vm9 = vcmask 744448   ;;  %v3469_v49 = vld [vmem:[%s3645_s1 + $0x30] sm:$0xff]  ;;  %vm1329_vm10 = vcmask 736256   ;;  %v3487_v54 = vld [vmem:[%s3645_s1 + $0x38] sm:$0xff] }
   0x6   :  { %353 = vrot.lane.b32.xlu1 %v33_v3, %s3225_s19  ;;  %2919 = vmatmul.mubr.msk.f32.vlgmr.msra.gmra.mrb[0].mxu0 %vm34_vm1, %v3267_v4  ;;  %v3505_v59 = vld [vmem:[%s3645_s1 + $0x40] sm:$0xff]  ;;  %vm1487_vm11 = vcmask 261120  }
   0x7   :  { %3055 = vmatprep.mubr.msk.f32.mxu1 %vm3223_vm2, %v3222_v2  ;;  %271 = vmatprep.mubr.f32.mxu0 %v3222_v2 }
   0x8   :  { %193 = vrot.lane.b32.xlu0 %v30_v1, %s3224_s16 }
   0x9   :  { %3219 = vset.pattern.permute.xlu0 %v3232_v14 }
   0xa   :  { %351 = vrot.lane.b32.xlu1 %v29_v0, %s3225_s19 }
   0xc   :  { %355 = vrot.lane.b32.xlu0 %v30_v1, %s3225_s19 }
   0xe   :  { %517 = vrot.lane.b32.xlu1 %v30_v1, %s3226_s20 }
  0x10   :  { %515 = vrot.lane.b32.xlu0 %v33_v3, %s3226_s20 }
  0x12   :  { %677 = vrot.lane.b32.xlu1 %v33_v3, %s3227_s21 }
  0x14   :  { %513 = vrot.lane.b32.xlu0 %v29_v0, %s3226_s20 }
  0x16   :  { %675 = vrot.lane.b32.xlu1 %v29_v0, %s3227_s21 }
  0x18   :  { %679 = vrot.lane.b32.xlu0 %v30_v1, %s3227_s21 }
  0x1a   :  { %841 = vrot.lane.b32.xlu1 %v30_v1, %s3228_s22 }
  0x1c   :  { %839 = vrot.lane.b32.xlu0 %v33_v3, %s3228_s22 }
  0x1e   :  { %1001 = vrot.lane.b32.xlu1 %v33_v3, %s3229_s23 }
  0x20   :  { %837 = vrot.lane.b32.xlu0 %v29_v0, %s3228_s22 }
  0x22   :  { %999 = vrot.lane.b32.xlu1 %v29_v0, %s3229_s23 }
  0x24   :  { %1003 = vrot.lane.b32.xlu0 %v30_v1, %s3229_s23 }
  0x26   :  { %1165 = vrot.lane.b32.xlu1 %v30_v1, %s3230_s24 }
  0x28   :  { %1163 = vrot.lane.b32.xlu0 %v33_v3, %s3230_s24 }
  0x2a   :  { %1325 = vrot.lane.b32.xlu1 %v33_v3, %s3231_s25 }
  0x2c   :  { %1161 = vrot.lane.b32.xlu0 %v29_v0, %s3230_s24 }
  0x2e   :  { %1323 = vrot.lane.b32.xlu1 %v29_v0, %s3231_s25 }
  0x30   :  { %1327 = vrot.lane.b32.xlu0 %v30_v1, %s3231_s25 }
  0x32   :  { %1649 = vrot.lane.b32.xlu1 %v3310_v6, %s3224_s16 }
  0x34   :  { %1647 = vrot.lane.b32.xlu0 %v3315_v7, %s3224_s16 }
  0x36   :  { %1805 = vrot.lane.b32.xlu1 %v3315_v7, %s3225_s19 }
  0x38   :  { %1645 = vrot.lane.b32.xlu0 %v3304_v5, %s3224_s16 }
  0x3a   :  { %1803 = vrot.lane.b32.xlu1 %v3304_v5, %s3225_s19 }
  0x3c   :  { %1807 = vrot.lane.b32.xlu0 %v3310_v6, %s3225_s19 }
  0x3e   :  { %1965 = vrot.lane.b32.xlu1 %v3310_v6, %s3226_s20 }
  0x40   :  { %1963 = vrot.lane.b32.xlu0 %v3315_v7, %s3226_s20 }
  0x42   :  { %2121 = vrot.lane.b32.xlu1 %v3315_v7, %s3227_s21 }
  0x44   :  { %1961 = vrot.lane.b32.xlu0 %v3304_v5, %s3226_s20 }
  0x46   :  { %2119 = vrot.lane.b32.xlu1 %v3304_v5, %s3227_s21 }
  0x48   :  { %2123 = vrot.lane.b32.xlu0 %v3310_v6, %s3227_s21 }
  0x4a   :  { %2281 = vrot.lane.b32.xlu1 %v3310_v6, %s3228_s22 }
  0x4c   :  { %2279 = vrot.lane.b32.xlu0 %v3315_v7, %s3228_s22 }
  0x4e   :  { %2437 = vrot.lane.b32.xlu1 %v3315_v7, %s3229_s23 }
  0x50   :  { %2277 = vrot.lane.b32.xlu0 %v3304_v5, %s3228_s22 }
  0x52   :  { %2435 = vrot.lane.b32.xlu1 %v3304_v5, %s3229_s23 }
  0x54   :  { %2439 = vrot.lane.b32.xlu0 %v3310_v6, %s3229_s23 }
  0x56   :  { %2597 = vrot.lane.b32.xlu1 %v3310_v6, %s3230_s24 }
  0x58   :  { %2595 = vrot.lane.b32.xlu0 %v3315_v7, %s3230_s24 }
  0x5a   :  { %2753 = vrot.lane.b32.xlu1 %v3315_v7, %s3231_s25 }
  0x5c   :  { %2593 = vrot.lane.b32.xlu0 %v3304_v5, %s3230_s24 }
  0x5e   :  { %2751 = vrot.lane.b32.xlu1 %v3304_v5, %s3231_s25 }
  0x60   :  { %2755 = vrot.lane.b32.xlu0 %v3310_v6, %s3231_s25 }
  0x64   :  { %26 = vperm.xlu0 %3219, %v23_v19  }
  0x74   :  { %v190_v8 = vpop.permute.xlu1 %189 }
  0x76   :  { %v192_v9 = vpop.permute.xlu0 %191 }
  0x77   :  { %v196_v15 = vsel %vm195_vm3, %v190_v8, %v192_v9 }
  0x78   :  { %v354_v10 = vpop.permute.xlu1 %353 }
  0x7a   :  { %v194_v12 = vpop.permute.xlu0 %193 }
  0x7b   :  { %v197_v13 = vsel %vm195_vm3, %v192_v9, %v194_v12  ;;  %3054 = vmatpush3.msk.msra.mxu1 %vm38_vm0, %v194_v12 }
  0x7c   :  { %2922 = vmatprep.subr.msk.mxu0 %vm38_vm0, %v197_v13  ;;  %3056 = vmatmul.mubr.msk.f32.vlgmr.msra.gmra.mrb[0].mxu1 %vm34_vm1, %v3368_v11  ;;  %v352_v16 = vpop.permute.xlu1 %351 }
  0x7d   :  { %2923 = vmatpush1.msk.msra.mxu0 %vm38_vm0, %v196_v15  ;;  %3058 = vmatprep.subr.mxu1 %v3222_v2  ;;  %v358_v18 = vsel %vm357_vm4, %v352_v16, %v354_v10 }
  0x7e   :  { %v356_v17 = vpop.permute.xlu0 %355  ;;  %2924 = vmatmul.mubr.msk.f32.vlgmr.msra.gmra.mrb[0].mxu0 %vm34_vm1, %v3368_v11  ;;  %3060 = vmatprep.mubr.msk.f32.mxu1 %vm3223_vm2, %v3222_v2 }
  0x7f   :  { %v359_v20 = vsel %vm357_vm4, %v354_v10, %v356_v17  ;;  %3059 = vmatpush3.msk.msra.mxu1 %vm38_vm0, %v356_v17  ;;  %433 = vmatprep.mubr.f32.mxu0 %v3222_v2 }
  0x80   :  { %2927 = vmatprep.subr.msk.mxu0 %vm38_vm0, %v359_v20  ;;  %v518_v21 = vpop.permute.xlu1 %517  ;;  %3063 = vmatprep.subr.mxu1 %v3222_v2 }
  0x81   :  { %2928 = vmatpush1.msk.msra.mxu0 %vm38_vm0, %v358_v18 }
  0x82   :  { %v516_v23 = vpop.permute.xlu0 %515 }
  0x83   :  { %v521_v24 = vsel %vm519_vm5, %v516_v23, %v518_v21 }
  0x84   :  { %3061 = vmatmul.mubr.msk.f32.vlgmr.msra.gmra.mrb[0].mxu1 %vm34_vm1, %v3395_v22  ;;  %2932 = vmatprep.subr.msk.mxu0 %vm38_vm0, %v521_v24  ;;  %v678_v25 = vpop.permute.xlu1 %677 }
  0x85   :  { %3064 = vmatpush3.msk.msra.mxu1 %vm38_vm0, %v518_v21  ;;  %3065 = vmatprep.mubr.msk.f32.mxu1 %vm3223_vm2, %v3222_v2 }
  0x86   :  { %2929 = vmatmul.mubr.msk.f32.vlgmr.msra.gmra.mrb[0].mxu0 %vm34_vm1, %v3395_v22  ;;  %v514_v26 = vpop.permute.xlu0 %513  ;;  %3068 = vmatprep.subr.mxu1 %v3222_v2 }
  0x87   :  { %v520_v27 = vsel %vm519_vm5, %v514_v26, %v516_v23  ;;  %595 = vmatprep.mubr.f32.mxu0 %v3222_v2 }
  0x88   :  { %2933 = vmatpush1.msk.msra.mxu0 %vm38_vm0, %v520_v27  ;;  %v676_v28 = vpop.permute.xlu1 %675 }
  0x89   :  { %v682_v32 = vsel %vm681_vm6, %v676_v28, %v678_v25 }
  0x8a   :  { %v680_v30 = vpop.permute.xlu0 %679 }
  0x8b   :  { %v683_v31 = vsel %vm681_vm6, %v678_v25, %v680_v30 }
  0x8c   :  { %3066 = vmatmul.mubr.msk.f32.vlgmr.msra.gmra.mrb[0].mxu1 %vm34_vm1, %v3413_v29  ;;  %2937 = vmatprep.subr.msk.mxu0 %vm38_vm0, %v683_v31  ;;  %v842_v33 = vpop.permute.xlu1 %841 }
  0x8d   :  { %3069 = vmatpush3.msk.msra.mxu1 %vm38_vm0, %v680_v30  ;;  %3070 = vmatprep.mubr.msk.f32.mxu1 %vm3223_vm2, %v3222_v2 }
  0x8e   :  { %2934 = vmatmul.mubr.msk.f32.vlgmr.msra.gmra.mrb[0].mxu0 %vm34_vm1, %v3413_v29  ;;  %v840_v34 = vpop.permute.xlu0 %839  ;;  %3073 = vmatprep.subr.mxu1 %v3222_v2 }
  0x8f   :  { %2938 = vmatpush1.msk.msra.mxu0 %vm38_vm0, %v682_v32  ;;  %757 = vmatprep.mubr.f32.mxu0 %v3222_v2  ;;  %v845_v35 = vsel %vm843_vm7, %v840_v34, %v842_v33 }
  0x90   :  { %2942 = vmatprep.subr.msk.mxu0 %vm38_vm0, %v845_v35  ;;  %v1002_v36 = vpop.permute.xlu1 %1001 }
  0x92   :  { %v838_v38 = vpop.permute.xlu0 %837 }
  0x93   :  { %v844_v39 = vsel %vm843_vm7, %v838_v38, %v840_v34 }
  0x94   :  { %3071 = vmatmul.mubr.msk.f32.vlgmr.msra.gmra.mrb[0].mxu1 %vm34_vm1, %v3433_v37  ;;  %v1000_v41 = vpop.permute.xlu1 %999 }
  0x95   :  { %3074 = vmatpush3.msk.msra.mxu1 %vm38_vm0, %v842_v33  ;;  %3075 = vmatprep.mubr.msk.f32.mxu1 %vm3223_vm2, %v3222_v2  ;;  %v1006_v46 = vsel %vm1005_vm8, %v1000_v41, %v1002_v36 }
  0x96   :  { %2939 = vmatmul.mubr.msk.f32.vlgmr.msra.gmra.mrb[0].mxu0 %vm34_vm1, %v3433_v37  ;;  %v1004_v40 = vpop.permute.xlu0 %1003  ;;  %3078 = vmatprep.subr.mxu1 %v3222_v2 }
  0x97   :  { %2943 = vmatpush1.msk.msra.mxu0 %vm38_vm0, %v844_v39  ;;  %919 = vmatprep.mubr.f32.mxu0 %v3222_v2  ;;  %v1007_v42 = vsel %vm1005_vm8, %v1002_v36, %v1004_v40 }
  0x98   :  { %2947 = vmatprep.subr.msk.mxu0 %vm38_vm0, %v1007_v42  ;;  %v1166_v45 = vpop.permute.xlu1 %1165 }
  0x9a   :  { %v1164_v44 = vpop.permute.xlu0 %1163 }
  0x9b   :  { %v1169_v47 = vsel %vm1167_vm9, %v1164_v44, %v1166_v45 }
  0x9c   :  { %3076 = vmatmul.mubr.msk.f32.vlgmr.msra.gmra.mrb[0].mxu1 %vm34_vm1, %v3451_v43  ;;  %v1326_v51 = vpop.permute.xlu1 %1325 }
  0x9d   :  { %3079 = vmatpush3.msk.msra.mxu1 %vm38_vm0, %v1004_v40  ;;  %3080 = vmatprep.mubr.msk.f32.mxu1 %vm3223_vm2, %v3222_v2 }
  0x9e   :  { %2944 = vmatmul.mubr.msk.f32.vlgmr.msra.gmra.mrb[0].mxu0 %vm34_vm1, %v3451_v43  ;;  %v1162_v48 = vpop.permute.xlu0 %1161  ;;  %3083 = vmatprep.subr.mxu1 %v3222_v2 }
  0x9f   :  { %2948 = vmatpush1.msk.msra.mxu0 %vm38_vm0, %v1006_v46  ;;  %1081 = vmatprep.mubr.f32.mxu0 %v3222_v2  ;;  %v1168_v52 = vsel %vm1167_vm9, %v1162_v48, %v1164_v44 }
  0xa0   :  { %2952 = vmatprep.subr.msk.mxu0 %vm38_vm0, %v1169_v47  ;;  %v1324_v55 = vpop.permute.xlu1 %1323 }
  0xa1   :  { %v1330_v56 = vsel %vm1329_vm10, %v1324_v55, %v1326_v51 }
  0xa2   :  { %v1328_v50 = vpop.permute.xlu0 %1327 }
  0xa3   :  { %v1331_v53 = vsel %vm1329_vm10, %v1326_v51, %v1328_v50 }
  0xa4   :  { %3081 = vmatmul.mubr.msk.f32.vlgmr.msra.gmra.mrb[0].mxu1 %vm34_vm1, %v3469_v49  ;;  %v1650_v58 = vpop.permute.xlu1 %1649 }
  0xa5   :  { %3084 = vmatpush3.msk.msra.mxu1 %vm38_vm0, %v1166_v45  ;;  %3085 = vmatprep.mubr.msk.f32.mxu1 %vm3223_vm2, %v3222_v2 }
  0xa6   :  { %2949 = vmatmul.mubr.msk.f32.vlgmr.msra.gmra.mrb[0].mxu0 %vm34_vm1, %v3469_v49  ;;  %3088 = vmatprep.subr.mxu1 %v3222_v2  ;;  %v1648_v57 = vpop.permute.xlu0 %1647 }
  0xa7   :  { %2953 = vmatpush1.msk.msra.mxu0 %vm38_vm0, %v1168_v52  ;;  %1243 = vmatprep.mubr.f32.mxu0 %v3222_v2  ;;  %v1652_v62 = vsel %vm195_vm3, %v1648_v57, %v1650_v58 }
  0xa8   :  { %2957 = vmatprep.subr.msk.mxu0 %vm38_vm0, %v1331_v53  ;;  %v1806_v61 = vpop.permute.xlu1 %1805 }
  0xaa   :  { %v1646_v60 = vpop.permute.xlu0 %1645 }
  0xab   :  { %v1651_v0 = vsel %vm195_vm3, %v1646_v60, %v1648_v57 }
  0xac   :  { %3086 = vmatmul.mubr.msk.f32.vlgmr.msra.gmra.mrb[0].mxu1 %vm34_vm1, %v3487_v54  ;;  %v1804_v3 = vpop.permute.xlu1 %1803 }
  0xad   :  { %3089 = vmatpush3.msk.msra.mxu1 %vm38_vm0, %v1328_v50  ;;  %3090 = vmatprep.mubr.msk.f32.mxu1 %vm3223_vm2, %v3222_v2 }
  0xae   :  { %2954 = vmatmul.mubr.msk.f32.vlgmr.msra.gmra.mrb[0].mxu0 %vm34_vm1, %v3487_v54  ;;  %3093 = vmatprep.subr.mxu1 %v3222_v2  ;;  %v1808_v63 = vpop.permute.xlu0 %1807 }
  0xaf   :  { %2958 = vmatpush1.msk.msra.mxu0 %vm38_vm0, %v1330_v56  ;;  %1405 = vmatprep.mubr.f32.mxu0 %v3222_v2  ;;  %v1810_v1 = vsel %vm357_vm4, %v1806_v61, %v1808_v63 }
  0xb0   :  { %2964 = vmatprep.subr.msk.mxu0 %vm38_vm0, %v3315_v7  ;;  %v1809_v7 = vsel %vm357_vm4, %v1804_v3, %v1806_v61 }
  0xb4   :  { %3091 = vmatmul.mubr.msk.f32.vlgmr.msra.gmra.mrb[0].mxu1 %vm34_vm1, %v3505_v59 }
  0xb5   :  { %3094 = vmatpush3.msk.msra.mxu1 %vm38_vm0, %v3310_v6  ;;  %3095 = vmatprep.mubr.msk.f32.mxu1 %vm3223_vm2, %v3222_v2  ;;  %v1966_v6 = vpop.permute.xlu1 %1965 }
  0xb6   :  { %2959 = vmatmul.mubr.msk.f32.vlgmr.msra.gmra.mrb[0].mxu0 %vm34_vm1, %v3505_v59  ;;  %3098 = vmatprep.subr.mxu1 %v3222_v2 }
  0xb7   :  { %2965 = vmatpush1.msk.msra.mxu0 %vm38_vm0, %v3304_v5  ;;  %1565 = vmatprep.mubr.f32.mxu0 %v3222_v2  ;;  %v1964_v5 = vpop.permute.xlu0 %1963 }
  0xb8   :  { %3096 = vmatmul.mubr.msk.f32.vlgmr.msra.gmra.mrb[2].mxu1 %vm34_vm1, %v3267_v4  ;;  %2969 = vmatprep.subr.msk.mxu0 %vm38_vm0, %v1652_v62 }
  0xb9   :  { %3099 = vmatpush3.msk.msra.mxu1 %vm38_vm0, %v1650_v58  ;;  %3100 = vmatprep.mubr.msk.f32.mxu1 %vm3223_vm2, %v3222_v2  ;;  %v2122_v9 = vpop.permute.xlu1 %2121 }
  0xba   :  { %2966 = vmatmul.mubr.msk.f32.vlgmr.msra.gmra.mrb[2].mxu0 %vm34_vm1, %v3267_v4  ;;  %3103 = vmatprep.subr.mxu1 %v3222_v2  ;;  %v1968_v4 = vsel %vm519_vm5, %v1964_v5, %v1966_v6 }
  0xbb   :  { %2970 = vmatpush1.msk.msra.mxu0 %vm38_vm0, %v1651_v0  ;;  %1723 = vmatprep.mubr.f32.mxu0 %v3222_v2  ;;  %v1962_v8 = vpop.permute.xlu0 %1961 }
  0xbc   :  { %2974 = vmatprep.subr.msk.mxu0 %vm38_vm0, %v1810_v1  ;;  %v1967_v12 = vsel %vm519_vm5, %v1962_v8, %v1964_v5 }
  0xbd   :  { %v2120_v13 = vpop.permute.xlu1 %2119 }
  0xbe   :  { %v2125_v16 = vsel %vm681_vm6, %v2120_v13, %v2122_v9 }
  0xbf   :  { %v2124_v10 = vpop.permute.xlu0 %2123 }
  0xc0   :  { %3101 = vmatmul.mubr.msk.f32.vlgmr.msra.gmra.mrb[2].mxu1 %vm34_vm1, %v3368_v11 }
  0xc1   :  { %3104 = vmatpush3.msk.msra.mxu1 %vm38_vm0, %v1808_v63  ;;  %3105 = vmatprep.mubr.msk.f32.mxu1 %vm3223_vm2, %v3222_v2  ;;  %v2282_v15 = vpop.permute.xlu1 %2281 }
  0xc2   :  { %2971 = vmatmul.mubr.msk.f32.vlgmr.msra.gmra.mrb[2].mxu0 %vm34_vm1, %v3368_v11  ;;  %3108 = vmatprep.subr.mxu1 %v3222_v2  ;;  %v2126_v11 = vsel %vm681_vm6, %v2122_v9, %v2124_v10 }
  0xc3   :  { %2975 = vmatpush1.msk.msra.mxu0 %vm38_vm0, %v1809_v7  ;;  %1881 = vmatprep.mubr.f32.mxu0 %v3222_v2  ;;  %v2280_v14 = vpop.permute.xlu0 %2279 }
  0xc4   :  { %2979 = vmatprep.subr.msk.mxu0 %vm38_vm0, %v1968_v4  ;;  %v2284_v17 = vsel %vm843_vm7, %v2280_v14, %v2282_v15 }
  0xc5   :  { %v2438_v19 = vpop.permute.xlu1 %2437 }
  0xc7   :  { %v2278_v18 = vpop.permute.xlu0 %2277 }
  0xc8   :  { %3106 = vmatmul.mubr.msk.f32.vlgmr.msra.gmra.mrb[2].mxu1 %vm34_vm1, %v3395_v22  ;;  %v2283_v21 = vsel %vm843_vm7, %v2278_v18, %v2280_v14 }
  0xc9   :  { %3109 = vmatpush3.msk.msra.mxu1 %vm38_vm0, %v1966_v6  ;;  %3110 = vmatprep.mubr.msk.f32.mxu1 %vm3223_vm2, %v3222_v2  ;;  %v2436_v23 = vpop.permute.xlu1 %2435 }
  0xca   :  { %2976 = vmatmul.mubr.msk.f32.vlgmr.msra.gmra.mrb[2].mxu0 %vm34_vm1, %v3395_v22  ;;  %3113 = vmatprep.subr.mxu1 %v3222_v2  ;;  %v2441_v26 = vsel %vm1005_vm8, %v2436_v23, %v2438_v19 }
  0xcb   :  { %2980 = vmatpush1.msk.msra.mxu0 %vm38_vm0, %v1967_v12  ;;  %2039 = vmatprep.mubr.f32.mxu0 %v3222_v2  ;;  %v2440_v20 = vpop.permute.xlu0 %2439 }
  0xcc   :  { %2984 = vmatprep.subr.msk.mxu0 %vm38_vm0, %v2126_v11  ;;  %v2442_v22 = vsel %vm1005_vm8, %v2438_v19, %v2440_v20 }
  0xcd   :  { %v2598_v25 = vpop.permute.xlu1 %2597 }
  0xcf   :  { %v2596_v24 = vpop.permute.xlu0 %2595 }
  0xd0   :  { %3111 = vmatmul.mubr.msk.f32.vlgmr.msra.gmra.mrb[2].mxu1 %vm34_vm1, %v3413_v29  ;;  %v2600_v27 = vsel %vm1167_vm9, %v2596_v24, %v2598_v25 }
  0xd1   :  { %3114 = vmatpush3.msk.msra.mxu1 %vm38_vm0, %v2124_v10  ;;  %3115 = vmatprep.mubr.msk.f32.mxu1 %vm3223_vm2, %v3222_v2  ;;  %v2754_v30 = vpop.permute.xlu1 %2753 }
  0xd2   :  { %2981 = vmatmul.mubr.msk.f32.vlgmr.msra.gmra.mrb[2].mxu0 %vm34_vm1, %v3413_v29  ;;  %3118 = vmatprep.subr.mxu1 %v3222_v2 }
  0xd3   :  { %2985 = vmatpush1.msk.msra.mxu0 %vm38_vm0, %v2125_v16  ;;  %2197 = vmatprep.mubr.f32.mxu0 %v3222_v2  ;;  %v2594_v28 = vpop.permute.xlu0 %2593 }
  0xd4   :  { %2989 = vmatprep.subr.msk.mxu0 %vm38_vm0, %v2284_v17  ;;  %v2599_v31 = vsel %vm1167_vm9, %v2594_v28, %v2596_v24 }
  0xd5   :  { %v2752_v33 = vpop.permute.xlu1 %2751 }
  0xd6   :  { %v2757_v34 = vsel %vm1329_vm10, %v2752_v33, %v2754_v30 }
  0xd7   :  { %v2756_v29 = vpop.permute.xlu0 %2755 }
  0xd8   :  { %3116 = vmatmul.mubr.msk.f32.vlgmr.msra.gmra.mrb[2].mxu1 %vm34_vm1, %v3433_v37  ;;  %v2758_v32 = vsel %vm1329_vm10, %v2754_v30, %v2756_v29 }
  0xd9   :  { %3119 = vmatpush3.msk.msra.mxu1 %vm38_vm0, %v2282_v15  ;;  %3120 = vmatprep.mubr.msk.f32.mxu1 %vm3223_vm2, %v3222_v2 }
  0xda   :  { %2986 = vmatmul.mubr.msk.f32.vlgmr.msra.gmra.mrb[2].mxu0 %vm34_vm1, %v3433_v37  ;;  %3123 = vmatprep.subr.mxu1 %v3222_v2 }
  0xdb   :  { %2990 = vmatpush1.msk.msra.mxu0 %vm38_vm0, %v2283_v21  ;;  %2355 = vmatprep.mubr.f32.mxu0 %v3222_v2 }
  0xdc   :  { %2994 = vmatprep.subr.msk.mxu0 %vm38_vm0, %v2442_v22 }
  0xe0   :  { %3121 = vmatmul.mubr.msk.f32.vlgmr.msra.gmra.mrb[2].mxu1 %vm34_vm1, %v3451_v43 }
  0xe1   :  { %3124 = vmatpush3.msk.msra.mxu1 %vm38_vm0, %v2440_v20  ;;  %3125 = vmatprep.mubr.msk.f32.mxu1 %vm3223_vm2, %v3222_v2 }
  0xe2   :  { %2991 = vmatmul.mubr.msk.f32.vlgmr.msra.gmra.mrb[2].mxu0 %vm34_vm1, %v3451_v43  ;;  %3128 = vmatprep.subr.mxu1 %v3222_v2 }
  0xe3   :  { %2995 = vmatpush1.msk.msra.mxu0 %vm38_vm0, %v2441_v26  ;;  %2513 = vmatprep.mubr.f32.mxu0 %v3222_v2  ;;  %v27_v35 = vpop.permute.xlu0 %26 }
  0xe4   :  { %2999 = vmatprep.subr.msk.mxu0 %vm38_vm0, %v2600_v27 }
  0xe8   :  { %3126 = vmatmul.mubr.msk.f32.vlgmr.msra.gmra.mrb[2].mxu1 %vm34_vm1, %v3469_v49 }
  0xe9   :  { %3129 = vmatpush3.msk.msra.mxu1 %vm38_vm0, %v2598_v25  ;;  %3130 = vmatprep.mubr.msk.f32.mxu1 %vm3223_vm2, %v3222_v2 }
  0xea   :  { %2996 = vmatmul.mubr.msk.f32.vlgmr.msra.gmra.mrb[2].mxu0 %vm34_vm1, %v3469_v49  ;;  %3133 = vmatprep.subr.mxu1 %v3222_v2 }
  0xeb   :  { %3000 = vmatpush1.msk.msra.mxu0 %vm38_vm0, %v2599_v31  ;;  %2671 = vmatprep.mubr.f32.mxu0 %v3222_v2 }
  0xec   :  { %3004 = vmatprep.subr.msk.mxu0 %vm38_vm0, %v2758_v32 }
  0xf0   :  { %3131 = vmatmul.mubr.msk.f32.vlgmr.msra.gmra.mrb[2].mxu1 %vm34_vm1, %v3487_v54 }
  0xf1   :  { %3134 = vmatpush3.msk.msra.mxu1 %vm38_vm0, %v2756_v29  ;;  %3135 = vmatprep.mubr.msk.f32.mxu1 %vm3223_vm2, %v3222_v2 }
  0xf2   :  { %3001 = vmatmul.mubr.msk.f32.vlgmr.msra.gmra.mrb[2].mxu0 %vm34_vm1, %v3487_v54 }
  0xf3   :  { %3005 = vmatpush1.msk.msra.mxu0 %vm38_vm0, %v2757_v34  ;;  %2829 = vmatprep.mubr.f32.mxu0 %v3222_v2 }
  0xf8   :  { %3136 = vmatmul.mubr.msk.f32.vlgmr.msra.gmra.mrb[2].mxu1 %vm34_vm1, %v3505_v59 }
  0xfa   :  { %3006 = vmatmul.mubr.msk.f32.vlgmr.msra.gmra.mrb[2].mxu0 %vm34_vm1, %v3505_v59 }
 0x187   :  { %v1478_v36 = vpop.f32.mrb[0].mxu1 }
 0x188   :  { %v3140_v37 = vadd.f32 %v1478_v36, %v27_v35  ;;  %v3092_v38 = vpop.f32.mrb[1].mxu1 }
 0x189   :  { %v1407_v39 = vpop.f32.mrb[0].mxu0 }
 0x18a   :  { %v3138_v40 = vadd.f32 %v1407_v39, %v27_v35  ;;  %v1409_v41 = vpop.f32.mrb[1].mxu0  ;;  %1488 = vst.msk [vmem:[%s3647_s3 + $0x10] sm:$0xff] %vm1487_vm11, %v3140_v37 }
 0x18b   :  { %v3139_v42 = vadd.f32 %v1409_v41, %v27_v35 }
 0x18c   :  { %1485 = vst [vmem:[%s3647_s3] sm:$0xff] %v3138_v40 }
 0x18d   :  { %1486 = vst [vmem:[%s3647_s3 + $0x8] sm:$0xff] %v3139_v42 }
 0x1cb   :  { %v2902_v2 = vpop.f32.mrb[2].mxu1 }
 0x1cc   :  { %v3143_v43 = vadd.f32 %v2902_v2, %v27_v35  ;;  %v3137_v44 = vpop.f32.mrb[3].mxu1 }
 0x1cd   :  { %v2831_v45 = vpop.f32.mrb[2].mxu0 }
 0x1ce   :  { %3011 = vst.msk [vmem:[%s3647_s3 + $0x28] sm:$0xff] %vm1487_vm11, %v3143_v43  ;;  %v3141_v46 = vadd.f32 %v2831_v45, %v27_v35  ;;  %v2833_v47 = vpop.f32.mrb[3].mxu0 }
 0x1cf   :  { %v3142_v48 = vadd.f32 %v2833_v47, %v27_v35 }
 0x1d0   :  { %3009 = vst [vmem:[%s3647_s3 + $0x18] sm:$0xff] %v3141_v46 }
 0x1d1   :  { %3010 = vst [vmem:[%s3647_s3 + $0x20] sm:$0xff] %v3142_v48 }

</bundles_post_ra>
